<compile_context>
chip_gen: v7x
topology: tpu7x:2x2x1
jax: 0.10.0
libtpu: 0.0.40
codegen_flags: <defaults>
</compile_context>

<pallas_src>
import functools

import jax
import jax.numpy as jnp
from jax.experimental import pallas as pl
from jax.experimental.pallas import tpu as pltpu

_LANE = 128
_SUBLANE = 8
_NEG_BIG = -1e30


def _round_up(n, m):
    return ((n + m - 1) // m) * m


def _pad2(a, rows, cols, fill=0.0):
    r, c = a.shape
    return jnp.pad(a, ((0, rows - r), (0, cols - c)), constant_values=fill)


def _flash_sab_kernel(xq_ref, xkv_ref, wq_ref, bq_ref, wk_ref, bk_ref,
                      wv_ref, bv_ref, wf_ref, bf_ref,
                      o_ref,
                      q_sc, m_sc, l_sc, acc_sc,
                      *, n_valid, block_kv, need_kv_mask):
    j = pl.program_id(1)
    n_kv_blocks = pl.num_programs(1)

    # ---- per query-block init (first kv step) --------------------------------
    @pl.when(j == 0)
    def _init():
        # 1/hidden_size scaling is already folded into wq/bq by the wrapper.
        q_sc[...] = (jnp.dot(xq_ref[...], wq_ref[...],
                             preferred_element_type=jnp.float32) + bq_ref[...])
        m_sc[...] = jnp.full(m_sc.shape, -jnp.inf, dtype=jnp.float32)
        l_sc[...] = jnp.zeros(l_sc.shape, dtype=jnp.float32)
        acc_sc[...] = jnp.zeros(acc_sc.shape, dtype=jnp.float32)

    # ---- project the current k/v row block -----------------------------------
    xkv = xkv_ref[...]
    k = jnp.dot(xkv, wk_ref[...], preferred_element_type=jnp.float32) + bk_ref[...]
    v = jnp.dot(xkv, wv_ref[...], preferred_element_type=jnp.float32) + bv_ref[...]

    # scores: contract over the hidden dim directly (no explicit k.T transpose)
    s = jax.lax.dot_general(q_sc[...], k,
                            dimension_numbers=(((1,), (1,)), ((), ())),
                            preferred_element_type=jnp.float32)   # (tq, tk)

    if need_kv_mask:
        # padded key rows (global index >= n_valid) must not feed the softmax
        kv_idx = jax.lax.broadcasted_iota(jnp.int32, s.shape, 1) + j * block_kv
        s = jnp.where(kv_idx < n_valid, s, _NEG_BIG)

    # ---- online softmax update ------------------------------------------------
    m_new = jnp.maximum(m_sc[...], jnp.max(s, axis=-1, keepdims=True))
    alpha = jnp.exp(m_sc[...] - m_new)
    p = jnp.exp(s - m_new)
    l_sc[...] = alpha * l_sc[...] + jnp.sum(p, axis=-1, keepdims=True)
    acc_sc[...] = alpha * acc_sc[...] + jnp.dot(
        p, v, preferred_element_type=jnp.float32)
    m_sc[...] = m_new

    # ---- last kv step: normalize, final linear, log_softmax, dense store -----
    @pl.when(j == n_kv_blocks - 1)
    def _finalize():
        out = acc_sc[...] * pl.reciprocal(l_sc[...], approx=True)   # EUP vrcp
        logits = (jnp.dot(out, wf_ref[...],
                          preferred_element_type=jnp.float32) + bf_ref[...])
        lm = jnp.max(logits, axis=-1, keepdims=True)
        shifted = logits - lm
        # padded class columns carry a -1e30 bias -> exp underflows to 0,
        # so they do not perturb the normalizer.
        o_ref[...] = shifted - jnp.log(
            jnp.sum(jnp.exp(shifted), axis=-1, keepdims=True))


def sab_npt_simple(x, params, *, block_rows=128, vmem_limit_bytes=None):
    """x: (1, N, D) float32 (NPT batch=1).  Returns (N, dim_output) log-probs."""
    assert x.ndim == 3 and x.shape[0] == 1, "NPT-style: batch must be 1"
    x2 = x[0].astype(jnp.float32)                      # (N, D)
    n, d = x2.shape
    wq, bq, wk, bk, wv, bv, wf, bf = params
    c = wf.shape[1]

    # lane-dense padding for the hidden / class dims
    d_pad = _round_up(max(d, _LANE), _LANE)
    c_pad = _round_up(max(c, _LANE), _LANE)

    # single row-tile size used for query and kv blocks
    t = min(block_rows, _round_up(n, _SUBLANE))
    t = _round_up(t, _SUBLANE)
    n_pad = _round_up(n, t)

    inv_d = jnp.float32(1.0 / d)       # NPT scales by the *original* hidden size
    x_p = _pad2(x2, n_pad, d_pad)
    wq_p = _pad2(wq * inv_d, d_pad, d_pad)
    bq_p = _pad2(bq * inv_d, 1, d_pad)
    wk_p = _pad2(wk, d_pad, d_pad)
    bk_p = _pad2(bk, 1, d_pad)
    wv_p = _pad2(wv, d_pad, d_pad)
    bv_p = _pad2(bv, 1, d_pad)
    wf_p = _pad2(wf, d_pad, c_pad)
    bf_p = _pad2(bf, 1, c_pad, fill=_NEG_BIG)          # kill padded logit cols

    # explicit VMEM budget (weights + double-buffered tiles + scratch), capped
    # at 64 MiB so the same config also fits v7x.
    f32 = 4
    est = f32 * (
        2 * (3 * d_pad * d_pad + d_pad * c_pad + 3 * d_pad + c_pad)  # weights
        + 2 * 2 * t * d_pad                                          # x tiles
        + 2 * t * c_pad                                              # out tile
        + 2 * t * d_pad + 2 * t                                      # scratch
    )
    if vmem_limit_bytes is None:
        vmem_limit_bytes = int(min(64 * 1024 * 1024,
                                   max(16 * 1024 * 1024, 2 * est)))

    const2d = lambda shape: pl.BlockSpec(shape, lambda i, j: (0, 0))
    kernel = functools.partial(_flash_sab_kernel,
                               n_valid=n, block_kv=t,
                               need_kv_mask=(n_pad != n))

    out_padded = pl.pallas_call(
        kernel,
        out_shape=jax.ShapeDtypeStruct((n_pad, c_pad), jnp.float32),
        grid=(n_pad // t, n_pad // t),
        in_specs=[
            pl.BlockSpec((t, d_pad), lambda i, j: (i, 0)),   # x (query rows)
            pl.BlockSpec((t, d_pad), lambda i, j: (j, 0)),   # x (key/value rows)
            const2d((d_pad, d_pad)), const2d((1, d_pad)),    # W_q*, b_q*  (pre-scaled)
            const2d((d_pad, d_pad)), const2d((1, d_pad)),    # W_k, b_k
            const2d((d_pad, d_pad)), const2d((1, d_pad)),    # W_v, b_v
            const2d((d_pad, c_pad)), const2d((1, c_pad)),    # W_final, b_final
        ],
        out_specs=pl.BlockSpec((t, c_pad), lambda i, j: (i, 0)),
        scratch_shapes=[
            pltpu.VMEM((t, d_pad), jnp.float32),   # q block
            pltpu.VMEM((t, 1), jnp.float32),       # running max
            pltpu.VMEM((t, 1), jnp.float32),       # running sum
            pltpu.VMEM((t, d_pad), jnp.float32),   # output accumulator
        ],
        compiler_params=pltpu.CompilerParams(
            dimension_semantics=("parallel", "arbitrary"),
            vmem_limit_bytes=vmem_limit_bytes),
    )(x_p, x_p, wq_p, bq_p, wk_p, bk_p, wv_p, bv_p, wf_p, bf_p)

    return out_padded[:n, :c]


def _reference(x, params):
    x2 = x[0]
    wq, bq, wk, bk, wv, bv, wf, bf = params
    d = x2.shape[1]
    q = x2 @ wq + bq
    k = x2 @ wk + bk
    v = x2 @ wv + bv
    attn = jax.nn.softmax((q / d) @ k.T, axis=-1)
    out = attn @ v
    logits = out @ wf + bf
    return jax.nn.log_softmax(logits, axis=-1)


def make_params(key, dim_hidden, dim_output):
    """Synthetic parameters matching the module's nn.Linear layers, stored
    pre-transposed to (in_features, out_features)."""
    ks = jax.random.split(key, 8)
    scale = 0.1
    wq = scale * jax.random.normal(ks[0], (dim_hidden, dim_hidden), jnp.float32)
    bq = scale * jax.random.normal(ks[1], (1, dim_hidden), jnp.float32)
    wk = scale * jax.random.normal(ks[2], (dim_hidden, dim_hidden), jnp.float32)
    bk = scale * jax.random.normal(ks[3], (1, dim_hidden), jnp.float32)
    wv = scale * jax.random.normal(ks[4], (dim_hidden, dim_hidden), jnp.float32)
    bv = scale * jax.random.normal(ks[5], (1, dim_hidden), jnp.float32)
    wf = scale * jax.random.normal(ks[6], (dim_hidden, dim_output), jnp.float32)
    bf = scale * jax.random.normal(ks[7], (1, dim_output), jnp.float32)
    return (wq, bq, wk, bk, wv, bv, wf, bf)


if __name__ == "__main__":
    key = jax.random.PRNGKey(0)
    k1, k2, k3, k4 = jax.random.split(key, 4)

    # dropout(p=0) is the identity and mask_identity=False -> no diag masking.
    # Tolerance is 1e-3: approx (EUP) reciprocal + online-softmax reordering.

    # Case 1: toy NPT shapes (exercises D/C lane padding and kv-row masking).
    n1, d1, c1 = 12, 32, 2
    x1 = jax.random.normal(k1, (1, n1, d1), jnp.float32)
    p1 = make_params(k2, d1, c1)
    out1 = jax.block_until_ready(sab_npt_simple(x1, p1))
    ref1 = _reference(x1, p1)
    assert out1.shape == (n1, c1)
    assert jnp.allclose(out1, ref1, atol=1e-3, rtol=1e-3), "case1 mismatch"

    # Case 2: multi-block grid (3x3 row tiles of 128) -> exercises the
    # flash-style online softmax across kv tiles with a masked tail block.
    n2, d2, c2 = 300, 64, 10
    x2 = jax.random.normal(k3, (1, n2, d2), jnp.float32)
    p2 = make_params(k4, d2, c2)
    out2 = jax.block_until_ready(sab_npt_simple(x2, p2))
    ref2 = _reference(x2, p2)
    assert out2.shape == (n2, c2)
    assert jnp.allclose(out2, ref2, atol=1e-3, rtol=1e-3), "case2 mismatch"

    print("KERNEL_OK")
</pallas_src>

<mosaic_0001>
module attributes {stable_mosaic.version = 11 : i64} {
  func.func @_flash_sab_kernel(%arg0: i32, %arg1: i32, %arg2: memref<16x128xf32, #tpu.memory_space<vmem>>, %arg3: memref<16x128xf32, #tpu.memory_space<vmem>>, %arg4: memref<128x128xf32, #tpu.memory_space<vmem>>, %arg5: memref<1x128xf32, #tpu.memory_space<vmem>>, %arg6: memref<128x128xf32, #tpu.memory_space<vmem>>, %arg7: memref<1x128xf32, #tpu.memory_space<vmem>>, %arg8: memref<128x128xf32, #tpu.memory_space<vmem>>, %arg9: memref<1x128xf32, #tpu.memory_space<vmem>>, %arg10: memref<128x128xf32, #tpu.memory_space<vmem>>, %arg11: memref<1x128xf32, #tpu.memory_space<vmem>>, %arg12: memref<16x128xf32, #tpu.memory_space<vmem>>, %arg13: memref<16x128xf32, #tpu.memory_space<vmem>>, %arg14: memref<16x1xf32, #tpu.memory_space<vmem>>, %arg15: memref<16x1xf32, #tpu.memory_space<vmem>>, %arg16: memref<16x128xf32, #tpu.memory_space<vmem>>) attributes {dimension_semantics = [#tpu.dimension_semantics<parallel>, #tpu.dimension_semantics<arbitrary>], iteration_bounds = array<i64: 1, 1>, scalar_prefetch = 0 : i64, scratch_operands = 4 : i64, tpu.core_type = #tpu.core_type<tc>, window_params = [{transform_indices = @transform_0, window_bounds = array<i64: 16, 128>}, {transform_indices = @transform_1, window_bounds = array<i64: 16, 128>}, {pipeline_mode = #tpu.pipeline_mode<synchronous>, transform_indices = @transform_2, window_bounds = array<i64: 128, 128>}, {pipeline_mode = #tpu.pipeline_mode<synchronous>, transform_indices = @transform_3, window_bounds = array<i64: 1, 128>}, {pipeline_mode = #tpu.pipeline_mode<synchronous>, transform_indices = @transform_4, window_bounds = array<i64: 128, 128>}, {pipeline_mode = #tpu.pipeline_mode<synchronous>, transform_indices = @transform_5, window_bounds = array<i64: 1, 128>}, {pipeline_mode = #tpu.pipeline_mode<synchronous>, transform_indices = @transform_6, window_bounds = array<i64: 128, 128>}, {pipeline_mode = #tpu.pipeline_mode<synchronous>, transform_indices = @transform_7, window_bounds = array<i64: 1, 128>}, {pipeline_mode = #tpu.pipeline_mode<synchronous>, transform_indices = @transform_8, window_bounds = array<i64: 128, 128>}, {pipeline_mode = #tpu.pipeline_mode<synchronous>, transform_indices = @transform_9, window_bounds = array<i64: 1, 128>}, {transform_indices = @transform_10, window_bounds = array<i64: 16, 128>}]} {
    %c0_i32 = arith.constant 0 : i32
    %0 = arith.cmpi eq, %arg1, %c0_i32 : i32
    %1 = arith.extui %0 : i1 to i32
    %c0_i32_0 = arith.constant 0 : i32
    %2 = arith.cmpi ne, %1, %c0_i32_0 : i32
    scf.if %2 {
      %c0_34 = arith.constant 0 : index
      %c0_35 = arith.constant 0 : index
      %50 = vector.load %arg2[%c0_34, %c0_35] : memref<16x128xf32, #tpu.memory_space<vmem>>, vector<16x128xf32>
      %c0_36 = arith.constant 0 : index
      %c0_37 = arith.constant 0 : index
      %51 = vector.load %arg4[%c0_36, %c0_37] : memref<128x128xf32, #tpu.memory_space<vmem>>, vector<128x128xf32>
      %cst_38 = arith.constant dense<0.000000e+00> : vector<16x128xf32>
      %52 = tpu.matmul %50, %51, %cst_38 {dimension_numbers = #tpu.dot_dimension_numbers<[1], [0], [0], [1], [0, 0, 1, 1], [], []>} : vector<16x128xf32>, vector<128x128xf32>, vector<16x128xf32> -> vector<16x128xf32>
      %c0_39 = arith.constant 0 : index
      %c0_40 = arith.constant 0 : index
      %53 = vector.load %arg5[%c0_39, %c0_40] : memref<1x128xf32, #tpu.memory_space<vmem>>, vector<1x128xf32>
      %54 = vector.broadcast %53 : vector<1x128xf32> to vector<16x128xf32>
      %55 = arith.addf %52, %54 : vector<16x128xf32>
      %c0_41 = arith.constant 0 : index
      %c0_42 = arith.constant 0 : index
      %56 = vector.load %arg13[%c0_41, %c0_42] : memref<16x128xf32, #tpu.memory_space<vmem>>, vector<16x128xf32>
      tpu.vector_store %arg13[%c0_41, %c0_42], %55 {strides = array<i32>} : memref<16x128xf32, #tpu.memory_space<vmem>>, vector<16x128xf32>,
      %cst_43 = arith.constant 0xFF800000 : f32
      %57 = vector.broadcast %cst_43 : f32 to vector<16x1xf32>
      %c0_44 = arith.constant 0 : index
      %c0_45 = arith.constant 0 : index
      %58 = vector.load %arg14[%c0_44, %c0_45] : memref<16x1xf32, #tpu.memory_space<vmem>>, vector<16x1xf32>
      tpu.vector_store %arg14[%c0_44, %c0_45], %57 {strides = array<i32>} : memref<16x1xf32, #tpu.memory_space<vmem>>, vector<16x1xf32>,
      %cst_46 = arith.constant 0.000000e+00 : f32
      %59 = vector.broadcast %cst_46 : f32 to vector<16x1xf32>
      %c0_47 = arith.constant 0 : index
      %c0_48 = arith.constant 0 : index
      %60 = vector.load %arg15[%c0_47, %c0_48] : memref<16x1xf32, #tpu.memory_space<vmem>>, vector<16x1xf32>
      tpu.vector_store %arg15[%c0_47, %c0_48], %59 {strides = array<i32>} : memref<16x1xf32, #tpu.memory_space<vmem>>, vector<16x1xf32>,
      %cst_49 = arith.constant 0.000000e+00 : f32
      %61 = vector.broadcast %cst_49 : f32 to vector<16x128xf32>
      %c0_50 = arith.constant 0 : index
      %c0_51 = arith.constant 0 : index
      %62 = vector.load %arg16[%c0_50, %c0_51] : memref<16x128xf32, #tpu.memory_space<vmem>>, vector<16x128xf32>
      tpu.vector_store %arg16[%c0_50, %c0_51], %61 {strides = array<i32>} : memref<16x128xf32, #tpu.memory_space<vmem>>, vector<16x128xf32>,
    } else {
    }
    %c0 = arith.constant 0 : index
    %c0_1 = arith.constant 0 : index
    %3 = vector.load %arg3[%c0, %c0_1] : memref<16x128xf32, #tpu.memory_space<vmem>>, vector<16x128xf32>
    %c0_2 = arith.constant 0 : index
    %c0_3 = arith.constant 0 : index
    %4 = vector.load %arg6[%c0_2, %c0_3] : memref<128x128xf32, #tpu.memory_space<vmem>>, vector<128x128xf32>
    %cst = arith.constant dense<0.000000e+00> : vector<16x128xf32>
    %5 = tpu.matmul %3, %4, %cst {dimension_numbers = #tpu.dot_dimension_numbers<[1], [0], [0], [1], [0, 0, 1, 1], [], []>} : vector<16x128xf32>, vector<128x128xf32>, vector<16x128xf32> -> vector<16x128xf32>
    %c0_4 = arith.constant 0 : index
    %c0_5 = arith.constant 0 : index
    %6 = vector.load %arg7[%c0_4, %c0_5] : memref<1x128xf32, #tpu.memory_space<vmem>>, vector<1x128xf32>
    %7 = vector.broadcast %6 : vector<1x128xf32> to vector<16x128xf32>
    %8 = arith.addf %5, %7 : vector<16x128xf32>
    %c0_6 = arith.constant 0 : index
    %c0_7 = arith.constant 0 : index
    %9 = vector.load %arg8[%c0_6, %c0_7] : memref<128x128xf32, #tpu.memory_space<vmem>>, vector<128x128xf32>
    %cst_8 = arith.constant dense<0.000000e+00> : vector<16x128xf32>
    %10 = tpu.matmul %3, %9, %cst_8 {dimension_numbers = #tpu.dot_dimension_numbers<[1], [0], [0], [1], [0, 0, 1, 1], [], []>} : vector<16x128xf32>, vector<128x128xf32>, vector<16x128xf32> -> vector<16x128xf32>
    %c0_9 = arith.constant 0 : index
    %c0_10 = arith.constant 0 : index
    %11 = vector.load %arg9[%c0_9, %c0_10] : memref<1x128xf32, #tpu.memory_space<vmem>>, vector<1x128xf32>
    %12 = vector.broadcast %11 : vector<1x128xf32> to vector<16x128xf32>
    %13 = arith.addf %10, %12 : vector<16x128xf32>
    %c0_11 = arith.constant 0 : index
    %c0_12 = arith.constant 0 : index
    %14 = vector.load %arg13[%c0_11, %c0_12] : memref<16x128xf32, #tpu.memory_space<vmem>>, vector<16x128xf32>
    %cst_13 = arith.constant dense<0.000000e+00> : vector<16x16xf32>
    %15 = tpu.matmul %14, %8, %cst_13 {dimension_numbers = #tpu.dot_dimension_numbers<[1], [1], [0], [0], [0, 0, 1, 0], [], []>} : vector<16x128xf32>, vector<16x128xf32>, vector<16x16xf32> -> vector<16x16xf32>
    %16 = tpu.iota {dimensions = array<i32: 1>} : vector<16x16xi32>
    %c16_i32 = arith.constant 16 : i32
    %17 = arith.muli %arg1, %c16_i32 : i32
    %18 = vector.broadcast %17 : i32 to vector<16x16xi32>
    %19 = arith.addi %16, %18 : vector<16x16xi32>
    %c12_i32 = arith.constant 12 : i32
    %20 = vector.broadcast %c12_i32 : i32 to vector<16x16xi32>
    %21 = arith.cmpi slt, %19, %20 : vector<16x16xi32>
    %cst_14 = arith.constant -1.000000e+30 : f32
    %22 = vector.broadcast %cst_14 : f32 to vector<16x16xf32>
    %23 = arith.select %21, %15, %22 : vector<16x16xi1>, vector<16x16xf32>
    %c0_15 = arith.constant 0 : index
    %c0_16 = arith.constant 0 : index
    %24 = vector.load %arg14[%c0_15, %c0_16] : memref<16x1xf32, #tpu.memory_space<vmem>>, vector<16x1xf32>
    %cst_17 = arith.constant dense<0xFF800000> : vector<16xf32>
    %25 = vector.multi_reduction <maximumf>, %23, %cst_17 [1] : vector<16x16xf32> to vector<16xf32>
    %26 = vector.shape_cast %25 : vector<16xf32> to vector<16x1xf32>
    %27 = arith.maximumf %24, %26 : vector<16x1xf32>
    %c0_18 = arith.constant 0 : index
    %c0_19 = arith.constant 0 : index
    %28 = vector.load %arg14[%c0_18, %c0_19] : memref<16x1xf32, #tpu.memory_space<vmem>>, vector<16x1xf32>
    %29 = arith.subf %28, %27 : vector<16x1xf32>
    %30 = math.exp %29 : vector<16x1xf32>
    %31 = vector.broadcast %27 : vector<16x1xf32> to vector<16x16xf32>
    %32 = arith.subf %23, %31 : vector<16x16xf32>
    %33 = math.exp %32 : vector<16x16xf32>
    %c0_20 = arith.constant 0 : index
    %c0_21 = arith.constant 0 : index
    %34 = vector.load %arg15[%c0_20, %c0_21] : memref<16x1xf32, #tpu.memory_space<vmem>>, vector<16x1xf32>
    %35 = arith.mulf %30, %34 : vector<16x1xf32>
    %cst_22 = arith.constant dense<0.000000e+00> : vector<16xf32>
    %36 = vector.multi_reduction <add>, %33, %cst_22 [1] : vector<16x16xf32> to vector<16xf32>
    %37 = vector.shape_cast %36 : vector<16xf32> to vector<16x1xf32>
    %38 = arith.addf %35, %37 : vector<16x1xf32>
    %c0_23 = arith.constant 0 : index
    %c0_24 = arith.constant 0 : index
    %39 = vector.load %arg15[%c0_23, %c0_24] : memref<16x1xf32, #tpu.memory_space<vmem>>, vector<16x1xf32>
    tpu.vector_store %arg15[%c0_23, %c0_24], %38 {strides = array<i32>} : memref<16x1xf32, #tpu.memory_space<vmem>>, vector<16x1xf32>,
    %c0_25 = arith.constant 0 : index
    %c0_26 = arith.constant 0 : index
    %40 = vector.load %arg16[%c0_25, %c0_26] : memref<16x128xf32, #tpu.memory_space<vmem>>, vector<16x128xf32>
    %41 = vector.broadcast %30 : vector<16x1xf32> to vector<16x128xf32>
    %42 = arith.mulf %41, %40 : vector<16x128xf32>
    %cst_27 = arith.constant dense<0.000000e+00> : vector<16x128xf32>
    %43 = tpu.matmul %33, %13, %cst_27 {dimension_numbers = #tpu.dot_dimension_numbers<[1], [0], [0], [1], [0, 0, 1, 1], [], []>} : vector<16x16xf32>, vector<16x128xf32>, vector<16x128xf32> -> vector<16x128xf32>
    %44 = arith.addf %42, %43 : vector<16x128xf32>
    %c0_28 = arith.constant 0 : index
    %c0_29 = arith.constant 0 : index
    %45 = vector.load %arg16[%c0_28, %c0_29] : memref<16x128xf32, #tpu.memory_space<vmem>>, vector<16x128xf32>
    tpu.vector_store %arg16[%c0_28, %c0_29], %44 {strides = array<i32>} : memref<16x128xf32, #tpu.memory_space<vmem>>, vector<16x128xf32>,
    %c0_30 = arith.constant 0 : index
    %c0_31 = arith.constant 0 : index
    %46 = vector.load %arg14[%c0_30, %c0_31] : memref<16x1xf32, #tpu.memory_space<vmem>>, vector<16x1xf32>
    tpu.vector_store %arg14[%c0_30, %c0_31], %27 {strides = array<i32>} : memref<16x1xf32, #tpu.memory_space<vmem>>, vector<16x1xf32>,
    %c0_i32_32 = arith.constant 0 : i32
    %47 = arith.cmpi eq, %arg1, %c0_i32_32 : i32
    %48 = arith.extui %47 : i1 to i32
    %c0_i32_33 = arith.constant 0 : i32
    %49 = arith.cmpi ne, %48, %c0_i32_33 : i32
    scf.if %49 {
      %c0_34 = arith.constant 0 : index
      %c0_35 = arith.constant 0 : index
      %50 = vector.load %arg16[%c0_34, %c0_35] : memref<16x128xf32, #tpu.memory_space<vmem>>, vector<16x128xf32>
      %c0_36 = arith.constant 0 : index
      %c0_37 = arith.constant 0 : index
      %51 = vector.load %arg15[%c0_36, %c0_37] : memref<16x1xf32, #tpu.memory_space<vmem>>, vector<16x1xf32>
      %52 = tpu.reciprocal %51 {approx = true} : vector<16x1xf32> -> vector<16x1xf32>
      %53 = vector.broadcast %52 : vector<16x1xf32> to vector<16x128xf32>
      %54 = arith.mulf %50, %53 : vector<16x128xf32>
      %c0_38 = arith.constant 0 : index
      %c0_39 = arith.constant 0 : index
      %55 = vector.load %arg10[%c0_38, %c0_39] : memref<128x128xf32, #tpu.memory_space<vmem>>, vector<128x128xf32>
      %cst_40 = arith.constant dense<0.000000e+00> : vector<16x128xf32>
      %56 = tpu.matmul %54, %55, %cst_40 {dimension_numbers = #tpu.dot_dimension_numbers<[1], [0], [0], [1], [0, 0, 1, 1], [], []>} : vector<16x128xf32>, vector<128x128xf32>, vector<16x128xf32> -> vector<16x128xf32>
      %c0_41 = arith.constant 0 : index
      %c0_42 = arith.constant 0 : index
      %57 = vector.load %arg11[%c0_41, %c0_42] : memref<1x128xf32, #tpu.memory_space<vmem>>, vector<1x128xf32>
      %58 = vector.broadcast %57 : vector<1x128xf32> to vector<16x128xf32>
      %59 = arith.addf %56, %58 : vector<16x128xf32>
      %cst_43 = arith.constant dense<0xFF800000> : vector<16xf32>
      %60 = vector.multi_reduction <maximumf>, %59, %cst_43 [1] : vector<16x128xf32> to vector<16xf32>
      %61 = vector.shape_cast %60 : vector<16xf32> to vector<16x1xf32>
      %62 = vector.broadcast %61 : vector<16x1xf32> to vector<16x128xf32>
      %63 = arith.subf %59, %62 : vector<16x128xf32>
      %64 = math.exp %63 : vector<16x128xf32>
      %cst_44 = arith.constant dense<0.000000e+00> : vector<16xf32>
      %65 = vector.multi_reduction <add>, %64, %cst_44 [1] : vector<16x128xf32> to vector<16xf32>
      %66 = vector.shape_cast %65 : vector<16xf32> to vector<16x1xf32>
      %67 = math.log %66 : vector<16x1xf32>
      %68 = vector.broadcast %67 : vector<16x1xf32> to vector<16x128xf32>
      %69 = arith.subf %63, %68 : vector<16x128xf32>
      %c0_45 = arith.constant 0 : index
      %c0_46 = arith.constant 0 : index
      %70 = vector.load %arg12[%c0_45, %c0_46] : memref<16x128xf32, #tpu.memory_space<vmem>>, vector<16x128xf32>
      tpu.vector_store %arg12[%c0_45, %c0_46], %69 {strides = array<i32>} : memref<16x128xf32, #tpu.memory_space<vmem>>, vector<16x128xf32>,
    } else {
    }
    return
  }
  func.func @transform_0(%arg0: i32, %arg1: i32) -> (i32, i32) {
    %c0_i32 = arith.constant 0 : i32
    %c0_i32_0 = arith.constant 0 : i32
    return %arg0, %c0_i32 : i32, i32
  }
  func.func @transform_1(%arg0: i32, %arg1: i32) -> (i32, i32) {
    %c0_i32 = arith.constant 0 : i32
    %c0_i32_0 = arith.constant 0 : i32
    return %arg1, %c0_i32 : i32, i32
  }
  func.func @transform_2(%arg0: i32, %arg1: i32) -> (i32, i32) {
    %c0_i32 = arith.constant 0 : i32
    %c0_i32_0 = arith.constant 0 : i32
    %c0_i32_1 = arith.constant 0 : i32
    return %c0_i32, %c0_i32_0 : i32, i32
  }
  func.func @transform_3(%arg0: i32, %arg1: i32) -> (i32, i32) {
    %c0_i32 = arith.constant 0 : i32
    %c0_i32_0 = arith.constant 0 : i32
    %c0_i32_1 = arith.constant 0 : i32
    return %c0_i32, %c0_i32_0 : i32, i32
  }
  func.func @transform_4(%arg0: i32, %arg1: i32) -> (i32, i32) {
    %c0_i32 = arith.constant 0 : i32
    %c0_i32_0 = arith.constant 0 : i32
    %c0_i32_1 = arith.constant 0 : i32
    return %c0_i32, %c0_i32_0 : i32, i32
  }
  func.func @transform_5(%arg0: i32, %arg1: i32) -> (i32, i32) {
    %c0_i32 = arith.constant 0 : i32
    %c0_i32_0 = arith.constant 0 : i32
    %c0_i32_1 = arith.constant 0 : i32
    return %c0_i32, %c0_i32_0 : i32, i32
  }
  func.func @transform_6(%arg0: i32, %arg1: i32) -> (i32, i32) {
    %c0_i32 = arith.constant 0 : i32
    %c0_i32_0 = arith.constant 0 : i32
    %c0_i32_1 = arith.constant 0 : i32
    return %c0_i32, %c0_i32_0 : i32, i32
  }
  func.func @transform_7(%arg0: i32, %arg1: i32) -> (i32, i32) {
    %c0_i32 = arith.constant 0 : i32
    %c0_i32_0 = arith.constant 0 : i32
    %c0_i32_1 = arith.constant 0 : i32
    return %c0_i32, %c0_i32_0 : i32, i32
  }
  func.func @transform_8(%arg0: i32, %arg1: i32) -> (i32, i32) {
    %c0_i32 = arith.constant 0 : i32
    %c0_i32_0 = arith.constant 0 : i32
    %c0_i32_1 = arith.constant 0 : i32
    return %c0_i32, %c0_i32_0 : i32, i32
  }
  func.func @transform_9(%arg0: i32, %arg1: i32) -> (i32, i32) {
    %c0_i32 = arith.constant 0 : i32
    %c0_i32_0 = arith.constant 0 : i32
    %c0_i32_1 = arith.constant 0 : i32
    return %c0_i32, %c0_i32_0 : i32, i32
  }
  func.func @transform_10(%arg0: i32, %arg1: i32) -> (i32, i32) {
    %c0_i32 = arith.constant 0 : i32
    %c0_i32_0 = arith.constant 0 : i32
    return %arg0, %c0_i32 : i32, i32
  }
}

</mosaic_0001>

<bundles_post_ra>
// kernel: tpu_custom_call.1
= control target key start
LH: loop header
LB: loop body
LE: loop exit
PB: predicated region body
PF: predicated region fallthrough
CT: control target
= control target key end

     0   :  { %15 = vsyncpa [#allocation7], 0  ;;  %s1621_s0 = inlined_call_operand.hbm [shape: f32[16,128], index: 0, kind: input, shape index: {}]   ;;  %s1622_s1 = inlined_call_operand.hbm [shape: f32[16,128], index: 1, kind: input, shape index: {}]   ;;  %s1623_s2 = inlined_call_operand.hbm [shape: f32[128,128], index: 2, kind: input, shape index: {}]   ;;  %s1624_s3 = inlined_call_operand.vmem [shape: f32[1,128], index: 3, kind: input, shape index: {}]   ;;  %s1625_s4 = inlined_call_operand.hbm [shape: f32[128,128], index: 4, kind: input, shape index: {}]   ;;  %s1626_s5 = inlined_call_operand.vmem [shape: f32[1,128], index: 5, kind: input, shape index: {}]   ;;  %s1627_s6 = inlined_call_operand.hbm [shape: f32[128,128], index: 6, kind: input, shape index: {}]   ;;  %s1628_s7 = inlined_call_operand.vmem [shape: f32[1,128], index: 7, kind: input, shape index: {}]   ;;  %s1629_s8 = inlined_call_operand.hbm [shape: f32[128,128], index: 8, kind: input, shape index: {}]   ;;  %s1630_s9 = inlined_call_operand.vmem [shape: f32[1,128], index: 9, kind: input, shape index: {}]   ;;  %s1631_s10 = inlined_call_operand.hbm [shape: f32[16,128], index: 10, kind: output, shape index: {}]  }
   0x1   :  { %16 = vsyncpa [#allocation10], 0 }
   0x2   :  { %17 = vsyncpa [#allocation13], 0 }
   0x3   :  { %18 = vsyncpa [#allocation16], 0 }
   0x4   :  { %19 = vsyncpa [#allocation8], 0  ;;  %s1398_s13 = smov [#allocation9]   ;;  %s1399_s15 = smov [#allocation12]  }
   0x5   :  { %s37_s14 = sshll.u32 %s1398_s13, 4  ;;  %s63_s16 = sshll.u32 %s1399_s15, 4  ;;  %s38_s14 = int_to_ptr.vmem [resolvable:$true] %s37_s14  ;;  %s1465_s16 = int_to_ptr.vmem [resolvable:$true] %s63_s16 }
   0x6   :  { %s1234_s19 = scalar_lea.hbm %s1622_s1, 256 }
   0x7   :  { %p1235_p0 = scmp.ne.s32.totalorder %s1622_s1, %s1234_s19  ;;  %p1238_p1 = scmp.lt.u32.totalorder %s1234_s19, %s1622_s1 }
   0x9   :  { %p1240_p2 = pnand %p1238_p1, %p1235_p0 }
   0xb   :  { %1243 = shalt.err (!%p1240_p2)
}
   0xc   :  { %s1244_s24 = scalar_lea.vmem %s38_s14, 256  ;;  %p1249_p4 = scmp.lt.s32.totalorder %s38_s14, %s38_s14 }
   0xd   :  { %p1245_p3 = scmp.ne.s32.totalorder %s38_s14, %s1244_s24  ;;  %p1250_p5 = scmp.lt.s32.totalorder %s1244_s24, %s1244_s24 }
   0xf   :  { %p1251_p6 = por %p1250_p5, %p1249_p4 }
  0x11   :  { %p1252_p7 = pnand %p1251_p6, %p1245_p3 }
  0x13   :  { %1255 = shalt.err (!%p1252_p7)
}
  0x14   :  { %s1400_s25 = smov 128   ;;  %s1401_s26 = smov 8  }
  0x15   :  { %43 = dma.hbm_to_vmem [thread:$0]  %s1622_s1, 256, %s38_s14, [#allocation10], %s1400_s25, %s1400_s25, %s1401_s26  }
  0x16   :  { %s1256_s11 = scalar_lea.hbm %s1625_s4, 2048 }
  0x17   :  { %p1257_p8 = scmp.ne.s32.totalorder %s1625_s4, %s1256_s11  ;;  %p1260_p9 = scmp.lt.u32.totalorder %s1256_s11, %s1625_s4 }
  0x19   :  { %p1262_p10 = pnand %p1260_p9, %p1257_p8 }
  0x1b   :  { %1265 = shalt.err (!%p1262_p10)
}
  0x1c   :  { %s1266_s18 = scalar_lea.vmem %s1465_s16, 2048  ;;  %p1271_p12 = scmp.lt.s32.totalorder %s1465_s16, %s1465_s16 }
  0x1d   :  { %p1267_p11 = scmp.ne.s32.totalorder %s1465_s16, %s1266_s18  ;;  %p1272_p13 = scmp.lt.s32.totalorder %s1266_s18, %s1266_s18 }
  0x1f   :  { %p1273_p0 = por %p1272_p13, %p1271_p12 }
  0x21   :  { %p1274_p1 = pnand %p1273_p0, %p1267_p11 }
  0x23   :  { %1277 = shalt.err (!%p1274_p1)
}
  0x24   :  { %69 = dma.hbm_to_vmem [thread:$0]  %s1625_s4, 2048, %s1465_s16, [#allocation13], %s1400_s25, %s1400_s25, %s1401_s26  }
  0x25   :  { %s1402_s19 = smov [#allocation6]   ;;  %s1403_s21 = smov [#allocation11]  }
  0x26   :  { %s25_s20 = sshll.u32 %s1402_s19, 4  ;;  %s49_s22 = sshll.u32 %s1403_s21, 4  ;;  %s26_s20 = int_to_ptr.vmem [resolvable:$true] %s25_s20  ;;  %s1502_s22 = int_to_ptr.vmem [resolvable:$true] %s49_s22 }
  0x27   :  { %s1278_s27 = scalar_lea.hbm %s1621_s0, 256 }
  0x28   :  { %p1279_p2 = scmp.ne.s32.totalorder %s1621_s0, %s1278_s27  ;;  %p1282_p3 = scmp.lt.u32.totalorder %s1278_s27, %s1621_s0 }
  0x2a   :  { %p1284_p4 = pnand %p1282_p3, %p1279_p2 }
  0x2c   :  { %1287 = shalt.err (!%p1284_p4)
}
  0x2d   :  { %s1288_s4 = scalar_lea.vmem %s26_s20, 256  ;;  %p1293_p6 = scmp.lt.s32.totalorder %s26_s20, %s26_s20 }
  0x2e   :  { %p1289_p5 = scmp.ne.s32.totalorder %s26_s20, %s1288_s4  ;;  %p1294_p7 = scmp.lt.s32.totalorder %s1288_s4, %s1288_s4 }
  0x30   :  { %p1295_p8 = por %p1294_p7, %p1293_p6 }
  0x32   :  { %p1296_p9 = pnand %p1295_p8, %p1289_p5 }
  0x34   :  { %1299 = shalt.err (!%p1296_p9)
}
  0x35   :  { %31 = dma.hbm_to_vmem [thread:$0]  %s1621_s0, 256, %s26_s20, [#allocation7], %s1400_s25, %s1400_s25, %s1401_s26  }
  0x36   :  { %s1300_s17 = scalar_lea.hbm %s1623_s2, 2048 }
  0x37   :  { %p1301_p10 = scmp.ne.s32.totalorder %s1623_s2, %s1300_s17  ;;  %p1304_p11 = scmp.lt.u32.totalorder %s1300_s17, %s1623_s2 }
  0x39   :  { %p1306_p12 = pnand %p1304_p11, %p1301_p10 }
  0x3b   :  { %1309 = shalt.err (!%p1306_p12)
}
  0x3c   :  { %s1310_s21 = scalar_lea.vmem %s1502_s22, 2048  ;;  %p1315_p0 = scmp.lt.s32.totalorder %s1502_s22, %s1502_s22 }
  0x3d   :  { %p1311_p13 = scmp.ne.s32.totalorder %s1502_s22, %s1310_s21  ;;  %p1316_p1 = scmp.lt.s32.totalorder %s1310_s21, %s1310_s21 }
  0x3f   :  { %p1317_p2 = por %p1316_p1, %p1315_p0 }
  0x41   :  { %p1318_p3 = pnand %p1317_p2, %p1311_p13 }
  0x43   :  { %1321 = shalt.err (!%p1318_p3)
}
  0x44   :  { %55 = dma.hbm_to_vmem [thread:$0]  %s1623_s2, 2048, %s1502_s22, [#allocation10], %s1400_s25, %s1400_s25, %s1401_s26  }
  0x45   :  { %s1404_s23 = smov [#allocation14]   ;;  %s1405_s27 = smov [#allocation15]  }
  0x46   :  { %s77_s24 = sshll.u32 %s1404_s23, 4  ;;  %s91_s28 = sshll.u32 %s1405_s27, 4  ;;  %s78_s24 = int_to_ptr.vmem [resolvable:$true] %s77_s24  ;;  %s1539_s28 = int_to_ptr.vmem [resolvable:$true] %s91_s28 }
  0x47   :  { %s1322_s11 = scalar_lea.hbm %s1627_s6, 2048 }
  0x48   :  { %p1323_p4 = scmp.ne.s32.totalorder %s1627_s6, %s1322_s11  ;;  %p1326_p5 = scmp.lt.u32.totalorder %s1322_s11, %s1627_s6 }
  0x4a   :  { %p1328_p6 = pnand %p1326_p5, %p1323_p4 }
  0x4c   :  { %1331 = shalt.err (!%p1328_p6)
}
  0x4d   :  { %s1332_s2 = scalar_lea.vmem %s78_s24, 2048  ;;  %p1337_p8 = scmp.lt.s32.totalorder %s78_s24, %s78_s24 }
  0x4e   :  { %p1333_p7 = scmp.ne.s32.totalorder %s78_s24, %s1332_s2  ;;  %p1338_p9 = scmp.lt.s32.totalorder %s1332_s2, %s1332_s2 }
  0x50   :  { %p1339_p10 = por %p1338_p9, %p1337_p8 }
  0x52   :  { %p1340_p11 = pnand %p1339_p10, %p1333_p7 }
  0x54   :  { %1343 = shalt.err (!%p1340_p11)
}
  0x55   :  { %83 = dma.hbm_to_vmem [thread:$0]  %s1627_s6, 2048, %s78_s24, [#allocation13], %s1400_s25, %s1400_s25, %s1401_s26  }
  0x56   :  { %s1344_s1 = scalar_lea.hbm %s1629_s8, 2048 }
  0x57   :  { %p1345_p12 = scmp.ne.s32.totalorder %s1629_s8, %s1344_s1  ;;  %p1348_p13 = scmp.lt.u32.totalorder %s1344_s1, %s1629_s8 }
  0x59   :  { %p1350_p0 = pnand %p1348_p13, %p1345_p12 }
  0x5b   :  { %1353 = shalt.err (!%p1350_p0)
}
  0x5c   :  { %s1354_s20 = scalar_lea.vmem %s1539_s28, 2048  ;;  %p1359_p2 = scmp.lt.s32.totalorder %s1539_s28, %s1539_s28 }
  0x5d   :  { %p1355_p1 = scmp.ne.s32.totalorder %s1539_s28, %s1354_s20  ;;  %p1360_p3 = scmp.lt.s32.totalorder %s1354_s20, %s1354_s20 }
  0x5f   :  { %p1361_p4 = por %p1360_p3, %p1359_p2 }
  0x61   :  { %p1362_p5 = pnand %p1361_p4, %p1355_p1 }
  0x63   :  { %1365 = shalt.err (!%p1362_p5)
}
  0x64   :  { %97 = dma.hbm_to_vmem [thread:$0]  %s1629_s8, 2048, %s1539_s28, [#allocation16], %s1400_s25, %s1400_s25, %s1401_s26  }
  0x65   :  { %1388 = dma.done.wait [#allocation7], 256  }
  0x66   :  { %1389 = vsyncadd [#allocation7], 4294967040 }
  0x67   :  { %1390 = dma.done.wait [#allocation10], 2304  }
  0x68   :  { %1391 = vsyncadd [#allocation10], 4294964992 }
  0x69   :  { %1392 = dma.done.wait [#allocation13], 4096  }
  0x6a   :  { %1393 = vsyncadd [#allocation13], 4294963200 }
  0x6b   :  { %1394 = dma.done.wait [#allocation16], 2048  }
  0x6c   :  { %1395 = vsyncadd [#allocation16], 4294965248  ;;  %v233_v0 = vld [vmem:[#allocation12] sm:$0xff]  ;;  %v234_v1 = vld [vmem:[#allocation12 + $0x8] sm:$0xff]  ;;  %vm224_vm0 = vcmask 7168   ;;  %vm516_vm2 = vcmask 130048  }
  0x6d   :  { %v235_v2 = vld [vmem:[#allocation12 + $0x10] sm:$0xff]  ;;  %v1096_v3 = vpack.c.bf16 %v234_v1, %v233_v0  ;;  %v236_v4 = vld [vmem:[#allocation12 + $0x18] sm:$0xff]  ;;  %v124_v5 = vld [vmem:[#allocation11] sm:$0xff] }
  0x6e   :  { %v125_v6 = vld [vmem:[#allocation11 + $0x8] sm:$0xff]  ;;  %v1100_v7 = vpack.c.bf16 %v236_v4, %v235_v2  ;;  %v237_v9 = vld [vmem:[#allocation12 + $0x20] sm:$0xff]  ;;  %v126_v11 = vld [vmem:[#allocation11 + $0x10] sm:$0xff] }
  0x6f   :  { %v1064_v8 = vpack.c.bf16 %v125_v6, %v124_v5  ;;  %v238_v10 = vld [vmem:[#allocation12 + $0x28] sm:$0xff]  ;;  %1097 = vmatprep.subr.bf16.mxu1 %v1096_v3  ;;  %v127_v12 = vld [vmem:[#allocation11 + $0x18] sm:$0xff]  ;;  %v128_v14 = vld [vmem:[#allocation11 + $0x20] sm:$0xff] }
  0x70   :  { %1099 = vmatpush3.bf16.msra.mxu1 %v1096_v3  ;;  %v1068_v13 = vpack.c.bf16 %v127_v12, %v126_v11  ;;  %v129_v15 = vld [vmem:[#allocation11 + $0x28] sm:$0xff]  ;;  %v1104_v16 = vpack.c.bf16 %v238_v10, %v237_v9  ;;  %v239_v17 = vld [vmem:[#allocation12 + $0x30] sm:$0xff]  ;;  %v240_v18 = vld [vmem:[#allocation12 + $0x38] sm:$0xff] }
  0x71   :  { %1065 = vmatprep.subr.bf16.mxu0 %v1064_v8  ;;  %1101 = vmatprep.subr.bf16.mxu1 %v1100_v7  ;;  %v1072_v19 = vpack.c.bf16 %v129_v15, %v128_v14  ;;  %v130_v20 = vld [vmem:[#allocation11 + $0x30] sm:$0xff]  ;;  %v131_v21 = vld [vmem:[#allocation11 + $0x38] sm:$0xff]  ;;  %v1108_v22 = vpack.c.bf16 %v240_v18, %v239_v17  ;;  %v241_v24 = vld [vmem:[#allocation12 + $0x40] sm:$0xff] }
  0x72   :  { %1067 = vmatpush3.bf16.msra.mxu0 %v1064_v8  ;;  %v1576_v23 = vld [vmem:[#allocation9] sm:$0xff]  ;;  %v242_v25 = vld [vmem:[#allocation12 + $0x48] sm:$0xff]  ;;  %v1076_v26 = vpack.c.bf16 %v131_v21, %v130_v20  ;;  %v132_v27 = vld [vmem:[#allocation11 + $0x40] sm:$0xff] }
  0x73   :  { %1069 = vmatprep.subr.bf16.mxu0 %v1068_v13  ;;  %977 = vmatprep.mubr.f32.mxu1 %v1576_v23  ;;  %v133_v28 = vld [vmem:[#allocation11 + $0x48] sm:$0xff]  ;;  %v122_v29 = vld [vmem:[#allocation6] sm:$0xff]  ;;  %v1112_v30 = vpack.c.bf16 %v242_v25, %v241_v24  ;;  %v243_v31 = vld [vmem:[#allocation12 + $0x50] sm:$0xff] }
  0x74   :  { %1103 = vmatpush3.bf16.msra.mxu1 %v1100_v7  ;;  %942 = vmatprep.mubr.f32.mxu0 %v122_v29  ;;  %v244_v32 = vld [vmem:[#allocation12 + $0x58] sm:$0xff]  ;;  %v1080_v33 = vpack.c.bf16 %v133_v28, %v132_v27  ;;  %v134_v34 = vld [vmem:[#allocation11 + $0x50] sm:$0xff]  ;;  %v245_v37 = vld [vmem:[#allocation12 + $0x60] sm:$0xff]  ;;  %v1406_v29 = vmov -inf  }
  0x75   :  { %1105 = vmatprep.subr.bf16.mxu1 %v1104_v16  ;;  %v135_v35 = vld [vmem:[#allocation11 + $0x58] sm:$0xff]  ;;  %v1116_v36 = vpack.c.bf16 %v244_v32, %v243_v31  ;;  %v246_v38 = vld [vmem:[#allocation12 + $0x68] sm:$0xff]  ;;  %v136_v40 = vld [vmem:[#allocation11 + $0x60] sm:$0xff]  ;;  %225 = vst.msk [vmem:[#allocation3] sm:$0xff] %vm224_vm0, %v1406_v29 }
  0x76   :  { %1071 = vmatpush3.bf16.msra.mxu0 %v1068_v13  ;;  %v1084_v39 = vpack.c.bf16 %v135_v35, %v134_v34  ;;  %v137_v41 = vld [vmem:[#allocation11 + $0x68] sm:$0xff]  ;;  %v1120_v42 = vpack.c.bf16 %v246_v38, %v245_v37  ;;  %v247_v43 = vld [vmem:[#allocation12 + $0x70] sm:$0xff]  ;;  %v248_v44 = vld [vmem:[#allocation12 + $0x78] sm:$0xff]  ;;  %226 = vst.msk [vmem:[#allocation3 + $0x8] sm:$0xff] %vm224_vm0, %v1406_v29  ;;  %v1407_v38 = vmov 0  }
  0x77   :  { %1073 = vmatprep.subr.bf16.mxu0 %v1072_v19  ;;  %v1088_v45 = vpack.c.bf16 %v137_v41, %v136_v40  ;;  %v138_v46 = vld [vmem:[#allocation11 + $0x70] sm:$0xff]  ;;  %v139_v47 = vld [vmem:[#allocation11 + $0x78] sm:$0xff]  ;;  %v1124_v48 = vpack.c.bf16 %v248_v44, %v247_v43  ;;  %v331_v50 = vld [vmem:[#allocation14] sm:$0xff]  ;;  %1212 = vset.pattern.permute.xlu1 %v1407_v38 }
  0x78   :  { %1107 = vmatpush3.bf16.msra.mxu1 %v1104_v16  ;;  %v1092_v49 = vpack.c.bf16 %v139_v47, %v138_v46  ;;  %v332_v51 = vld [vmem:[#allocation14 + $0x8] sm:$0xff]  ;;  %v333_v53 = vld [vmem:[#allocation14 + $0x10] sm:$0xff]  ;;  %v334_v54 = vld [vmem:[#allocation14 + $0x18] sm:$0xff]  ;;  %1213 = vset.pattern.permute.xlu0 %v1407_v38 }
  0x79   :  { %1109 = vmatprep.subr.bf16.mxu1 %v1108_v22  ;;  %v1128_v52 = vpack.c.bf16 %v332_v51, %v331_v50  ;;  %v232_v55 = vld [vmem:[#allocation9 + $0x8] sm:$0xff]  ;;  %v123_v56 = vld [vmem:[#allocation6 + $0x8] sm:$0xff]  ;;  %v1132_v57 = vpack.c.bf16 %v334_v54, %v333_v53  ;;  %v335_v58 = vld [vmem:[#allocation14 + $0x20] sm:$0xff] }
  0x7a   :  { %1075 = vmatpush3.bf16.msra.mxu0 %v1072_v19  ;;  %v336_v59 = vld [vmem:[#allocation14 + $0x28] sm:$0xff]  ;;  %v337_v61 = vld [vmem:[#allocation14 + $0x30] sm:$0xff]  ;;  %v338_v62 = vld [vmem:[#allocation14 + $0x38] sm:$0xff] }
  0x7b   :  { %1077 = vmatprep.subr.bf16.mxu0 %v1076_v26  ;;  %v1136_v60 = vpack.c.bf16 %v336_v59, %v335_v58  ;;  %v1140_v63 = vpack.c.bf16 %v338_v62, %v337_v61  ;;  %v339_v0 = vld [vmem:[#allocation14 + $0x40] sm:$0xff]  ;;  %v340_v1 = vld [vmem:[#allocation14 + $0x48] sm:$0xff]  ;;  %v341_v3 = vld [vmem:[#allocation14 + $0x50] sm:$0xff] }
  0x7c   :  { %1111 = vmatpush3.bf16.msra.mxu1 %v1108_v22  ;;  %v1144_v2 = vpack.c.bf16 %v340_v1, %v339_v0  ;;  %v342_v4 = vld [vmem:[#allocation14 + $0x58] sm:$0xff]  ;;  %v343_v6 = vld [vmem:[#allocation14 + $0x60] sm:$0xff]  ;;  %v344_v7 = vld [vmem:[#allocation14 + $0x68] sm:$0xff] }
  0x7d   :  { %1113 = vmatprep.subr.bf16.mxu1 %v1112_v30  ;;  %v1148_v5 = vpack.c.bf16 %v342_v4, %v341_v3  ;;  %v1152_v8 = vpack.c.bf16 %v344_v7, %v343_v6  ;;  %v345_v9 = vld [vmem:[#allocation14 + $0x70] sm:$0xff]  ;;  %v346_v10 = vld [vmem:[#allocation14 + $0x78] sm:$0xff]  ;;  %v825_v12 = vld [vmem:[%s1626_s5] ss:$0 sm:$0xff] }
  0x7e   :  { %1079 = vmatpush3.bf16.msra.mxu0 %v1076_v26  ;;  %v1156_v11 = vpack.c.bf16 %v346_v10, %v345_v9  ;;  %v824_v14 = vld [vmem:[%s1624_s3] ss:$0 sm:$0xff]  ;;  %v515_v43 = vld [vmem:[#allocation3 + $0x8] sm:$0xff]  ;;  %v686_v0 = vld [vmem:[#allocation15 + $0x10] sm:$0xff] }
  0x7f   :  { %1081 = vmatprep.subr.bf16.mxu0 %v1080_v33  ;;  %v514_v40 = vld [vmem:[#allocation3] sm:$0xff]  ;;  %v690_v7 = vld [vmem:[#allocation15 + $0x30] sm:$0xff] }
  0x80   :  { %1115 = vmatpush3.bf16.msra.mxu1 %v1112_v30  ;;  %v506_v30 = vlaneseq  ;;  %v684_v62 = vld [vmem:[#allocation15] sm:$0xff] }
  0x81   :  { %1117 = vmatprep.subr.bf16.mxu1 %v1116_v36  ;;  %v688_v4 = vld [vmem:[#allocation15 + $0x20] sm:$0xff] }
  0x82   :  { %1083 = vmatpush3.bf16.msra.mxu0 %v1080_v33  ;;  %v507_v31 = vand.u32 127, %v506_v30  ;;  %v692_v10 = vld [vmem:[#allocation15 + $0x40] sm:$0xff]  ;;  %v698_v30 = vld [vmem:[#allocation15 + $0x70] sm:$0xff] }
  0x83   :  { %1085 = vmatprep.subr.bf16.mxu0 %v1084_v39 }
  0x84   :  { %1119 = vmatpush3.bf16.msra.mxu1 %v1116_v36  ;;  %vm511_vm1 = vcmp.lt.s32.totalorder %v507_v31, 12  ;;  %v699_v31 = vld [vmem:[#allocation15 + $0x78] sm:$0xff] }
  0x85   :  { %1121 = vmatprep.subr.bf16.mxu1 %v1120_v42 }
  0x86   :  { %1087 = vmatpush3.bf16.msra.mxu0 %v1084_v39  ;;  %v1408_v39 = vmov 0.0  }
  0x87   :  { %1089 = vmatprep.subr.bf16.mxu0 %v1088_v45  ;;  %227 = vst.msk [vmem:[#allocation4] sm:$0xff] %vm224_vm0, %v1408_v39  ;;  %228 = vst.msk [vmem:[#allocation4 + $0x8] sm:$0xff] %vm224_vm0, %v1408_v39 }
  0x88   :  { %1123 = vmatpush3.bf16.msra.mxu1 %v1120_v42 }
  0x89   :  { %1125 = vmatprep.subr.bf16.mxu1 %v1124_v48 }
  0x8a   :  { %1091 = vmatpush3.bf16.msra.mxu0 %v1088_v45 }
  0x8b   :  { %1093 = vmatprep.subr.bf16.mxu0 %v1092_v49 }
  0x8c   :  { %1127 = vmatpush3.bf16.msra.mxu1 %v1124_v48 }
  0x8e   :  { %1095 = vmatpush3.bf16.msra.mxu0 %v1092_v49 }
  0x8f   :  { %1129 = vmatprep.subr.bf16.mxu0 %v1128_v52  ;;  %978 = vmatmul.mubr.f32.vlgmr.msra.gmra.mrb[0].mxu1 %v232_v55 }
  0x91   :  { %943 = vmatmul.mubr.f32.vlgmr.msra.gmra.mrb[0].mxu0 %v123_v56 }
  0x92   :  { %1131 = vmatpush3.bf16.msra.mxu0 %v1128_v52  ;;  %1012 = vmatprep.mubr.f32.mxu0 %v1576_v23  ;;  %v826_v23 = vld [vmem:[%s1628_s7] ss:$0 sm:$0xff]  ;;  %s1409_s7 = smov [#allocation17]  }
  0x93   :  { %1133 = vmatprep.subr.bf16.mxu0 %v1132_v57 }
  0x96   :  { %1135 = vmatpush3.bf16.msra.mxu0 %v1132_v57 }
  0x97   :  { %1137 = vmatprep.subr.bf16.mxu0 %v1136_v60 }
  0x9a   :  { %1139 = vmatpush3.bf16.msra.mxu0 %v1136_v60 }
  0x9b   :  { %1141 = vmatprep.subr.bf16.mxu0 %v1140_v63 }
  0x9e   :  { %1143 = vmatpush3.bf16.msra.mxu0 %v1140_v63  ;;  %v685_v63 = vld [vmem:[#allocation15 + $0x8] sm:$0xff] }
  0x9f   :  { %1145 = vmatprep.subr.bf16.mxu0 %v1144_v2  ;;  %v1168_v1 = vpack.c.bf16 %v685_v63, %v684_v62 }
  0xa2   :  { %1147 = vmatpush3.bf16.msra.mxu0 %v1144_v2  ;;  %v687_v2 = vld [vmem:[#allocation15 + $0x18] sm:$0xff] }
  0xa3   :  { %1149 = vmatprep.subr.bf16.mxu0 %v1148_v5  ;;  %v1172_v3 = vpack.c.bf16 %v687_v2, %v686_v0 }
  0xa6   :  { %1151 = vmatpush3.bf16.msra.mxu0 %v1148_v5  ;;  %v689_v5 = vld [vmem:[#allocation15 + $0x28] sm:$0xff] }
  0xa7   :  { %1153 = vmatprep.subr.bf16.mxu0 %v1152_v8  ;;  %v1176_v6 = vpack.c.bf16 %v689_v5, %v688_v4 }
  0xaa   :  { %1155 = vmatpush3.bf16.msra.mxu0 %v1152_v8  ;;  %v691_v8 = vld [vmem:[#allocation15 + $0x38] sm:$0xff] }
  0xab   :  { %1157 = vmatprep.subr.bf16.mxu0 %v1156_v11  ;;  %v1180_v9 = vpack.c.bf16 %v691_v8, %v690_v7 }
  0xae   :  { %1159 = vmatpush3.bf16.msra.mxu0 %v1156_v11  ;;  %v693_v11 = vld [vmem:[#allocation15 + $0x48] sm:$0xff] }
  0xb1   :  { %1013 = vmatmul.mubr.f32.vlgmr.msra.gmra.mrb[2].mxu0 %v232_v55 }
 0x162   :  { %v979_v13 = vpop.f32.mrb[0].mxu1 }
 0x163   :  { %v328_v15 = vadd.f32 %v979_v13, %v825_v12  ;;  %v322_v16 = vpop.f32.mrb[1].mxu1  ;;  %v694_v13 = vld [vmem:[#allocation15 + $0x50] sm:$0xff] }
 0x164   :  { %v944_v17 = vpop.f32.mrb[0].mxu0  ;;  %v323_v18 = vadd.f32 %v825_v12, %v322_v16  ;;  %v1184_v12 = vpack.c.bf16 %v693_v11, %v692_v10  ;;  %v696_v16 = vld [vmem:[#allocation15 + $0x60] sm:$0xff] }
 0x165   :  { %v213_v19 = vpop.f32.mrb[1].mxu0  ;;  %v219_v22 = vadd.f32 %v944_v17, %v824_v14  ;;  %v697_v17 = vld [vmem:[#allocation15 + $0x68] sm:$0xff] }
 0x166   :  { %v214_v20 = vadd.f32 %v824_v14, %v213_v19  ;;  %v1160_v21 = vpack.c.bf16 %v328_v15, %v323_v18  ;;  %v695_v14 = vld [vmem:[#allocation15 + $0x58] sm:$0xff]  ;;  %v1192_v18 = vpack.c.bf16 %v697_v17, %v696_v16  ;;  %v547_v19 = vld [vmem:[#allocation4] sm:$0xff] }
 0x167   :  { %v1188_v15 = vpack.c.bf16 %v695_v14, %v694_v13 }
 0x168   :  { %1019 = vmatprep.mubr.f32.mxu0 %v214_v20  ;;  %1161 = vmatprep.subr.bf16.mxu0 %v1160_v21 }
 0x169   :  { %1163 = vmatpush3.bf16.xpose.msra.mxu0 %v1160_v21 }
 0x170   :  { %1020 = vmatmul.mubr.f32.vlgmr.msra.gmra.mrb[4].mxu0 %v219_v22  ;;  %v548_v22 = vld [vmem:[#allocation4 + $0x8] sm:$0xff] }
 0x184   :  { %v1014_v24 = vpop.f32.mrb[2].mxu0 }
 0x185   :  { %v426_v25 = vadd.f32 %v1014_v24, %v826_v23  ;;  %v420_v26 = vpop.f32.mrb[3].mxu0 }
 0x186   :  { %v421_v27 = vadd.f32 %v826_v23, %v420_v26 }
 0x188   :  { %v1164_v28 = vpack.c.bf16 %v426_v25, %v421_v27 }
 0x18a   :  { %1165 = vmatprep.subr.bf16.mxu1 %v1164_v28 }
 0x18b   :  { %1167 = vmatpush3.bf16.msra.mxu1 %v1164_v28 }
 0x18c   :  { %1169 = vmatprep.subr.bf16.mxu1 %v1168_v1 }
 0x243   :  { %v1021_v32 = vpop.f32.mrb[4].mxu0 }
 0x244   :  { %v497_v33 = vpop.f32.mrb[5].mxu0  ;;  %v513_v36 = vsel %vm511_vm1, %v1021_v32, -1e+30  ;;  %v1196_v32 = vpack.c.bf16 %v699_v31, %v698_v30 }
 0x245   :  { %v512_v34 = vsel %vm511_vm1, %v497_v33, -1e+30  ;;  %v520_v37 = vsel %vm516_vm2, %v513_v36, -inf }
 0x246   :  { %v517_v35 = vsel %vm516_vm2, %v512_v34, -inf }
 0x247   :  { %518 = vmax.xlane.f32.xlu0 %v517_v35 }
 0x24b   :  { %521 = vmax.xlane.f32.xlu0 %v520_v37 }
 0x2d4   :  { %v519_v41 = vpop.xlane.xlu0 %518 }
 0x2d5   :  { %v523_v42 = vmax.f32 %v514_v40, %v519_v41 }
 0x2d7   :  { %v525_v44 = vsub.f32 %v514_v40, %v523_v42  ;;  %661 = vst.msk [vmem:[#allocation3] sm:$0xff] %vm224_vm0, %v523_v42  ;;  %533 = vperm.xlu1 %1212, %v523_v42  }
 0x2d8   :  { %v522_v45 = vpop.xlane.xlu0 %521 }
 0x2d9   :  { %v524_v46 = vmax.f32 %v515_v43, %v522_v45  ;;  %v527_v59 = vmul.f32 1.442695, %v525_v44 }
 0x2db   :  { %v526_v47 = vsub.f32 %v515_v43, %v524_v46  ;;  %662 = vst.msk [vmem:[#allocation3 + $0x8] sm:$0xff] %vm224_vm0, %v524_v46  ;;  %538 = vperm.xlu1 %1212, %v524_v46   ;;  %v829_v46 = vld [vmem:[%s1630_s9] ss:$0 sm:$0xff]  ;;  %s809_s9 = sshll.u32 %s1409_s7, 4  ;;  %s810_s9 = int_to_ptr.vmem [resolvable:$true] %s809_s9 }
 0x2dc   :  { %s1366_s11 = scalar_lea.vmem %s810_s9, 256  ;;  %p1371_p7 = scmp.lt.s32.totalorder %s810_s9, %s810_s9 }
 0x2dd   :  { %v529_v58 = vmul.f32 1.442695, %v526_v47  ;;  %p1367_p6 = scmp.ne.s32.totalorder %s810_s9, %s1366_s11  ;;  %p1372_p8 = scmp.lt.s32.totalorder %s1366_s11, %s1366_s11 }
 0x2df   :  { %p1373_p9 = por %p1372_p8, %p1371_p7 }
 0x2e1   :  { %p1374_p10 = pnand %p1373_p9, %p1367_p6 }
 0x356   :  { %v534_v48 = vpop.permute.xlu1 %533 }
 0x357   :  { %v541_v49 = vsub.f32 %v512_v34, %v534_v48 }
 0x359   :  { %v543_v50 = vmul.f32 1.442695, %v541_v49 }
 0x35a   :  { %v539_v51 = vpop.permute.xlu1 %538 }
 0x35b   :  { %1214 = vpow2.f32 %v543_v50  ;;  %v542_v52 = vsub.f32 %v513_v36, %v539_v51 }
 0x35d   :  { %v545_v53 = vmul.f32 1.442695, %v542_v52 }
 0x35f   :  { %1216 = vpow2.f32 %v545_v53 }
 0x360   :  { %1218 = vpow2.f32 %v529_v58 }
 0x361   :  { %1220 = vpow2.f32 %v527_v59 }
 0x365   :  { %v1215_v54 = vpop.eup %1214 }
 0x366   :  { %1026 = vmatprep.mubr.msk.f32.mxu1 %vm516_vm2, %v1215_v54  ;;  %v551_v55 = vsel %vm516_vm2, %v1215_v54, 0.0 }
 0x367   :  { %552 = vadd.xlane.f32.xlu0 %v551_v55 }
 0x369   :  { %v1217_v56 = vpop.eup %1216 }
 0x36a   :  { %1027 = vmatmul.mubr.msk.f32.vlgmr.msra.gmra.mrb[2].mxu1 %vm516_vm2, %v1217_v56  ;;  %v554_v57 = vsel %vm516_vm2, %v1217_v56, 0.0  ;;  %v1219_v60 = vpop.eup %1218 }
 0x36b   :  { %555 = vadd.xlane.f32.xlu1 %v554_v57  ;;  %v1221_v61 = vpop.eup %1220  ;;  %1171 = vmatpush3.bf16.msra.mxu1 %v1168_v1  ;;  %v550_v24 = vmul.f32 %v1219_v60, %v548_v22 }
 0x36c   :  { %1173 = vmatprep.subr.bf16.mxu1 %v1172_v3  ;;  %v549_v20 = vmul.f32 %v1221_v61, %v547_v19 }
 0x36f   :  { %1175 = vmatpush3.bf16.msra.mxu1 %v1172_v3 }
 0x370   :  { %1177 = vmatprep.subr.bf16.mxu1 %v1176_v6 }
 0x373   :  { %1179 = vmatpush3.bf16.msra.mxu1 %v1176_v6 }
 0x374   :  { %1181 = vmatprep.subr.bf16.mxu1 %v1180_v9 }
 0x377   :  { %1183 = vmatpush3.bf16.msra.mxu1 %v1180_v9 }
 0x378   :  { %1185 = vmatprep.subr.bf16.mxu1 %v1184_v12 }
 0x37b   :  { %1187 = vmatpush3.bf16.msra.mxu1 %v1184_v12 }
 0x37c   :  { %571 = vperm.xlu1 %1212, %v1219_v60   ;;  %1189 = vmatprep.subr.bf16.mxu1 %v1188_v15 }
 0x37d   :  { %566 = vperm.xlu0 %1213, %v1221_v61  }
 0x37f   :  { %1191 = vmatpush3.bf16.msra.mxu1 %v1188_v15 }
 0x380   :  { %1193 = vmatprep.subr.bf16.mxu1 %v1192_v18 }
 0x383   :  { %1195 = vmatpush3.bf16.msra.mxu1 %v1192_v18 }
 0x384   :  { %1197 = vmatprep.subr.bf16.mxu1 %v1196_v32 }
 0x387   :  { %1199 = vmatpush3.bf16.msra.mxu1 %v1196_v32 }
 0x3f4   :  { %v553_v21 = vpop.xlane.xlu0 %552 }
 0x3f5   :  { %v557_v23 = vadd.f32 %v553_v21, %v549_v20 }
 0x3f7   :  { %560 = vst.msk [vmem:[#allocation4] sm:$0xff] %vm224_vm0, %v557_v23 }
 0x3f8   :  { %v556_v25 = vpop.xlane.xlu1 %555 }
 0x3f9   :  { %v558_v26 = vadd.f32 %v556_v25, %v550_v24 }
 0x3fb   :  { %561 = vst.msk [vmem:[#allocation4 + $0x8] sm:$0xff] %vm224_vm0, %v558_v26 }
 0x3fc   :  { %v567_v36 = vpop.permute.xlu0 %566  ;;  %v572_v38 = vpop.permute.xlu1 %571 }
 0x3fd   :  { %v574_v37 = vmul.f32 0.0, %v567_v36  ;;  %v575_v41 = vmul.f32 0.0, %v572_v38 }
 0x3fe   :  { %v668_v27 = vld [vmem:[#allocation4] sm:$0xff] }
 0x3ff   :  { %1222 = vrcp.f32 %v668_v27 }
 0x402   :  { %v669_v28 = vld [vmem:[#allocation4 + $0x8] sm:$0xff] }
 0x403   :  { %1224 = vrcp.f32 %v669_v28 }
 0x409   :  { %v1223_v29 = vpop.eup %1222 }
 0x40a   :  { %674 = vperm.xlu0 %1213, %v1223_v29  }
 0x40d   :  { %v1225_v33 = vpop.eup %1224 }
 0x40e   :  { %679 = vperm.xlu0 %1213, %v1225_v33  }
 0x43d   :  { %v1028_v34 = vpop.f32.mrb[2].mxu1 }
 0x43e   :  { %v648_v35 = vpop.f32.mrb[3].mxu1  ;;  %v658_v43 = vadd.f32 %v1028_v34, %v575_v41 }
 0x43f   :  { %v657_v39 = vadd.f32 %v648_v35, %v574_v37 }
 0x489   :  { %v675_v40 = vpop.permute.xlu0 %674 }
 0x48a   :  { %v682_v42 = vmul.f32 %v675_v40, %v657_v39 }
 0x48c   :  { %1061 = vmatprep.mubr.f32.mxu1 %v682_v42 }
 0x48d   :  { %v680_v44 = vpop.permute.xlu0 %679 }
 0x48e   :  { %v683_v45 = vmul.f32 %v680_v44, %v658_v43 }
 0x490   :  { %1062 = vmatmul.mubr.f32.vlgmr.msra.gmra.mrb[4].mxu1 %v683_v45 }
 0x563   :  { %v1063_v47 = vpop.f32.mrb[4].mxu1 }
 0x564   :  { %v779_v48 = vadd.f32 %v1063_v47, %v829_v46  ;;  %v773_v49 = vpop.f32.mrb[5].mxu1 }
 0x565   :  { %v774_v50 = vadd.f32 %v829_v46, %v773_v49 }
 0x566   :  { %784 = vmax.xlane.f32.xlu0 %v779_v48 }
 0x567   :  { %782 = vmax.xlane.f32.xlu1 %v774_v50 }
 0x5f3   :  { %v785_v51 = vpop.xlane.xlu0 %784 }
 0x5f4   :  { %v787_v52 = vsub.f32 %v779_v48, %v785_v51  ;;  %v783_v53 = vpop.xlane.xlu1 %782 }
 0x5f5   :  { %v786_v54 = vsub.f32 %v774_v50, %v783_v53 }
 0x5f6   :  { %v790_v55 = vmul.f32 1.442695, %v787_v52 }
 0x5f7   :  { %v788_v56 = vmul.f32 1.442695, %v786_v54 }
 0x5f8   :  { %1226 = vpow2.f32 %v790_v55 }
 0x5f9   :  { %1228 = vpow2.f32 %v788_v56 }
 0x602   :  { %v1227_v57 = vpop.eup %1226 }
 0x603   :  { %v1229_v58 = vpop.eup %1228  ;;  %794 = vadd.xlane.f32.xlu1 %v1227_v57 }
 0x604   :  { %792 = vadd.xlane.f32.xlu0 %v1229_v58 }
 0x690   :  { %v795_v59 = vpop.xlane.xlu1 %794 }
 0x691   :  { %1230 = vlog2.f32 %v795_v59  ;;  %v793_v60 = vpop.xlane.xlu0 %792 }
 0x692   :  { %1232 = vlog2.f32 %v793_v60 }
 0x69b   :  { %v1231_v61 = vpop.eup %1230 }
 0x69c   :  { %v1233_v62 = vpop.eup %1232  ;;  %v799_v63 = vmul.f32 0.6931472, %v1231_v61 }
 0x69d   :  { %v797_v0 = vmul.f32 0.6931472, %v1233_v62 }
 0x69e   :  { %v801_v1 = vsub.f32 %v787_v52, %v799_v63 }
 0x69f   :  { %v800_v2 = vsub.f32 %v786_v54, %v797_v0 }
 0x6a0   :  { %803 = vst [vmem:[#allocation17 + $0x8] sm:$0xff] %v801_v1 }
 0x6a1   :  { %802 = vst [vmem:[#allocation17] sm:$0xff] %v800_v2 }
 0x6a2   :  { %1377 = shalt.err (!%p1374_p10)
}
 0x6a3   :  { %s1378_s12 = scalar_lea.hbm %s1631_s10, 256 }
 0x6a4   :  { %p1379_p11 = scmp.ne.s32.totalorder %s1631_s10, %s1378_s12  ;;  %p1382_p12 = scmp.lt.u32.totalorder %s1378_s12, %s1631_s10 }
 0x6a6   :  { %p1384_p13 = pnand %p1382_p12, %p1379_p11 }
 0x6a8   :  { %1387 = shalt.err (!%p1384_p13)
}
 0x6a9   :  { %815 = dma.vmem_to_hbm [thread:$0]  %s810_s9, 256, %s1631_s10, [#allocation8], %s1400_s25, %s1400_s25, %s1401_s26  }
 0x6aa   :  { %1396 = dma.done.wait [#allocation8], 256  }
 0x6ab   :  { %1397 = vsyncadd [#allocation8], 4294967040 }
 0x6ac   :  { %819 = vsyncpa [#allocation7], 1 }
 0x6ad   :  { %820 = vsyncpa [#allocation10], 1 }
 0x6ae   :  { %821 = vsyncpa [#allocation13], 1 }
 0x6af   :  { %822 = vsyncpa [#allocation16], 1 }
 0x6b0   :  { %823 = vsyncpa [#allocation8], 1 }

</bundles_post_ra>
